<compile_context>
chip_gen: v6e
topology: v6e:2x2x1
jax: 0.10.0
libtpu: 0.0.40
codegen_flags: <defaults>
</compile_context>

<pallas_src>
import jax
import jax.numpy as jnp
from jax.experimental import pallas as pl
from jax.experimental.pallas import tpu as pltpu


LANE = 128


def _round_up(n, m):
    return ((n + m - 1) // m) * m


# -----------------------------------------------------------------------------
# Pallas kernel: per-timestep conditioned MLP (W^T form, transpose-free)
# -----------------------------------------------------------------------------
def _mlp_kernel(x_ref, ic_ref, cn_ref, cond_ref,
                w1x_ref, w1ic_ref, w2_ref, wcn_ref, out_ref):
    # Block shapes (one T tile, full batch folded into the block):
    #   x_ref    (B, Cx,  Tt) bf16     ic_ref   (B, Cic, Tt) bf16
    #   cn_ref   (B, Ccn, Tt) bf16     cond_ref (B, H, 1)    f32
    #   w1x_ref  (H, Cx)  bf16         w1ic_ref (H, Cic)     bf16
    #   w2_ref   (Cout, H) bf16        wcn_ref  (Cout, Ccn)  bf16
    #   out_ref  (B, Cout, Tt) f32
    w1x = w1x_ref[...]
    w1ic = w1ic_ref[...]
    w2 = w2_ref[...]
    wcn = wcn_ref[...]
    B = x_ref.shape[0]
    for b in range(B):   # small static batch -> unrolled, no length-B grid axis
        hid = (jnp.dot(w1x, x_ref[b], preferred_element_type=jnp.float32)
               + jnp.dot(w1ic, ic_ref[b], preferred_element_type=jnp.float32)
               + cond_ref[b])                                    # (H, Tt) f32
        hid = jnp.maximum(hid, 0.0).astype(w2.dtype)             # bf16 for MXU
        out = (jnp.dot(w2, hid, preferred_element_type=jnp.float32)
               + jnp.dot(wcn, cn_ref[b], preferred_element_type=jnp.float32))
        out_ref[b] = out.astype(out_ref.dtype)                   # lane-dense store


# -----------------------------------------------------------------------------
# The wrapper (JAX port of the PyTorch module)
# -----------------------------------------------------------------------------
class ConditionedControlNetDiffusionModelWrapperPallas:
    def __init__(self, params, io_channels, sample_rate, min_input_length,
                 diffusion_objective="v",
                 cross_attn_cond_ids=(), global_cond_ids=(),
                 input_concat_ids=(), prepend_cond_ids=(),
                 controlnet_cond_ids=(),
                 compute_dtype=jnp.bfloat16, max_t_tile=1024):
        self.params = params
        self.io_channels = io_channels
        self.sample_rate = sample_rate
        self.min_input_length = min_input_length
        self.diffusion_objective = diffusion_objective
        self.cross_attn_cond_ids = list(cross_attn_cond_ids)
        self.global_cond_ids = list(global_cond_ids)
        self.input_concat_ids = list(input_concat_ids)
        self.prepend_cond_ids = list(prepend_cond_ids)
        self.controlnet_cond_ids = list(controlnet_cond_ids)
        self.compute_dtype = compute_dtype
        self.max_t_tile = max_t_tile         # keep <= ~1024 on v7x (64 MiB VMEM)

        # Pre-transpose the big weights ONCE (W^T form) and cast for the MXU.
        cx = io_channels
        w1 = jnp.asarray(params["w1"])
        self._w1x_t = w1[:cx].T.astype(compute_dtype)                  # (H, Cx)
        self._w1ic_t = w1[cx:].T.astype(compute_dtype)                 # (H, Cic)
        self._w2_t = jnp.asarray(params["w2"]).T.astype(compute_dtype)   # (Cout, H)
        self._wcn_t = jnp.asarray(params["wcn"]).T.astype(compute_dtype)  # (Cout, Ccn)

    # -- conditioning aggregation (pure memory glue; XLA fuses it) -------------
    def get_conditioning_inputs(self, conditioning_tensors, negative=False):
        cross_attention_input = None
        cross_attention_masks = None
        global_cond = None
        input_concat_cond = None
        prepend_cond = None
        prepend_cond_mask = None
        controlnet_cond = None

        if len(self.cross_attn_cond_ids) > 0:
            ins, masks = [], []
            for key in self.cross_attn_cond_ids:
                ca_in, ca_mask = conditioning_tensors[key]
                if ca_in.ndim == 2:
                    ca_in = ca_in[:, None, :]
                    ca_mask = ca_mask[:, None]
                ins.append(ca_in)
                masks.append(ca_mask)
            cross_attention_input = jnp.concatenate(ins, axis=1)
            cross_attention_masks = jnp.concatenate(masks, axis=1)

        if len(self.global_cond_ids) > 0:
            global_conds = [conditioning_tensors[k][0] for k in self.global_cond_ids]
            global_cond = jnp.concatenate(global_conds, axis=-1)
            if global_cond.ndim == 3:
                global_cond = jnp.squeeze(global_cond, axis=1)

        if len(self.input_concat_ids) > 0:
            input_concat_cond = jnp.concatenate(
                [conditioning_tensors[k][0] for k in self.input_concat_ids], axis=1)

        if len(self.prepend_cond_ids) > 0:
            prepend_conds, prepend_masks = [], []
            for key in self.prepend_cond_ids:
                pc, pm = conditioning_tensors[key]
                prepend_conds.append(pc)
                prepend_masks.append(pm)
            prepend_cond = jnp.concatenate(prepend_conds, axis=1)
            prepend_cond_mask = jnp.concatenate(prepend_masks, axis=1)

        if len(self.controlnet_cond_ids) > 0:
            # torch.cat([c.unsqueeze(1) ...], 1).sum(1) == elementwise sum;
            # keep it as fused adds (no HBM round-trip through a stacked tensor).
            cns = [conditioning_tensors[k][0] for k in self.controlnet_cond_ids]
            controlnet_cond = cns[0]
            for c in cns[1:]:
                controlnet_cond = controlnet_cond + c

        if negative:
            return {"negative_cross_attn_cond": cross_attention_input,
                    "negative_cross_attn_mask": cross_attention_masks,
                    "negative_global_cond": global_cond,
                    "negative_input_concat_cond": input_concat_cond}
        return {"cross_attn_cond": cross_attention_input,
                "cross_attn_mask": cross_attention_masks,
                "global_cond": global_cond,
                "input_concat_cond": input_concat_cond,
                "prepend_cond": prepend_cond,
                "prepend_cond_mask": prepend_cond_mask,
                "controlnet_cond": controlnet_cond}

    # -- Pallas hot path --------------------------------------------------------
    def _run_mlp(self, x, t, input_concat_cond, controlnet_cond,
                 cross_attn_cond, cross_attn_mask, global_cond,
                 prepend_cond, prepend_cond_mask):
        p = self.params
        f32 = jnp.float32
        B, Cx, T = x.shape
        Cic = input_concat_cond.shape[1]
        Ccn = controlnet_cond.shape[1]
        H = self._w1x_t.shape[0]
        Cout = self._w2_t.shape[0]

        # Hoisted conditioning bias (tiny per-batch mat-vecs; f32, outside grid).
        cam = cross_attn_mask.astype(f32)
        ppm = prepend_cond_mask.astype(f32)
        ca_pool = (jnp.einsum("bs,bsd->bd", cam, cross_attn_cond.astype(f32))
                   / (jnp.sum(cam, axis=-1, keepdims=True) + 1e-6))
        pp_pool = (jnp.einsum("bp,bpd->bd", ppm, prepend_cond.astype(f32))
                   / (jnp.sum(ppm, axis=-1, keepdims=True) + 1e-6))
        cond = (ca_pool @ p["wca"] + global_cond.astype(f32) @ p["wg"]
                + pp_pool @ p["wpp"]
                + t.astype(f32)[:, None] * p["wt"][0])           # (B, H)
        cond3 = cond[:, :, None]                                 # (B, H, 1)

        # Lane-dense T padding / tiling (multiples of 128).
        t_tile = min(_round_up(T, LANE), self.max_t_tile)
        Tp = _round_up(T, t_tile)
        pad = Tp - T
        cd = self.compute_dtype

        def prep(a):
            a = a.astype(cd)
            if pad:
                a = jnp.pad(a, ((0, 0), (0, 0), (0, pad)))
            return a

        xp = prep(x)
        icp = prep(input_concat_cond)
        cnp = prep(controlnet_cond)

        def seq_spec(c):
            return pl.BlockSpec((B, c, t_tile), lambda i: (0, 0, i))

        def full_spec(shape):
            nd = len(shape)
            return pl.BlockSpec(shape, lambda i, nd=nd: (0,) * nd)

        out_p = pl.pallas_call(
            _mlp_kernel,
            out_shape=jax.ShapeDtypeStruct((B, Cout, Tp), f32),
            grid=(Tp // t_tile,),
            in_specs=[
                seq_spec(Cx), seq_spec(Cic), seq_spec(Ccn),
                full_spec(cond3.shape),
                full_spec(self._w1x_t.shape), full_spec(self._w1ic_t.shape),
                full_spec(self._w2_t.shape), full_spec(self._wcn_t.shape),
            ],
            out_specs=pl.BlockSpec((B, Cout, t_tile), lambda i: (0, 0, i)),
            compiler_params=pltpu.CompilerParams(
                dimension_semantics=("parallel",)),
        )(xp, icp, cnp, cond3, self._w1x_t, self._w1ic_t,
          self._w2_t, self._wcn_t)

        return out_p[:, :, :T]

    def forward(self, x, t, cond):
        ci = self.get_conditioning_inputs(cond)
        return self._run_mlp(
            x, t, ci["input_concat_cond"], ci["controlnet_cond"],
            ci["cross_attn_cond"], ci["cross_attn_mask"], ci["global_cond"],
            ci["prepend_cond"], ci["prepend_cond_mask"])

    __call__ = forward


# -----------------------------------------------------------------------------
# pure-JAX reference (same quantization: bf16 operands, f32 accumulation)
# -----------------------------------------------------------------------------
def reference_forward(params, compute_dtype, x, t, ic, cn, ca, cam, g, pp, ppm):
    f32 = jnp.float32
    cam = cam.astype(f32)
    ppm = ppm.astype(f32)
    ca_pool = (jnp.einsum("bs,bsd->bd", cam, ca.astype(f32))
               / (jnp.sum(cam, -1, keepdims=True) + 1e-6))
    pp_pool = (jnp.einsum("bp,bpd->bd", ppm, pp.astype(f32))
               / (jnp.sum(ppm, -1, keepdims=True) + 1e-6))
    cond = (ca_pool @ params["wca"] + g.astype(f32) @ params["wg"]
            + pp_pool @ params["wpp"]
            + t.astype(f32)[:, None] * params["wt"][0])          # (B, H)

    cx = x.shape[1]
    q = lambda a: jnp.asarray(a).astype(compute_dtype).astype(f32)
    w1x, w1ic = q(params["w1"][:cx].T), q(params["w1"][cx:].T)
    w2, wcn = q(params["w2"].T), q(params["wcn"].T)

    hid = (jnp.einsum("hc,bct->bht", w1x, q(x))
           + jnp.einsum("hc,bct->bht", w1ic, q(ic))
           + cond[:, :, None])
    hid = q(jnp.maximum(hid, 0.0))
    out = (jnp.einsum("oh,bht->bot", w2, hid)
           + jnp.einsum("oc,bct->bot", wcn, q(cn)))
    return out


# -----------------------------------------------------------------------------
if __name__ == "__main__":
    key = jax.random.PRNGKey(0)
    ks = jax.random.split(key, 20)

    # small, module-consistent shapes
    B, T = 2, 16
    io_channels = 4          # Cx = Cout
    Cic = 2                  # input-concat channels (2 keys x 1 channel)
    Ccn = 3                  # controlnet channels
    Dca, Dg, Dp, H = 32, 16, 32, 32
    S1, P = 7, 4

    params = {
        "w1":  0.1 * jax.random.normal(ks[0], (io_channels + Cic, H), jnp.float32),
        "wca": 0.1 * jax.random.normal(ks[1], (Dca, H), jnp.float32),
        "wg":  0.1 * jax.random.normal(ks[2], (Dg, H), jnp.float32),
        "wpp": 0.1 * jax.random.normal(ks[3], (Dp, H), jnp.float32),
        "wt":  0.1 * jax.random.normal(ks[4], (1, H), jnp.float32),
        "w2":  0.1 * jax.random.normal(ks[5], (H, io_channels), jnp.float32),
        "wcn": 0.1 * jax.random.normal(ks[6], (Ccn, io_channels), jnp.float32),
    }

    # conditioning tensors dict: key -> (tensor, mask)
    prompt = jax.random.normal(ks[7], (B, S1, Dca), jnp.float32)
    prompt_mask = (jnp.arange(S1)[None, :] < jnp.array([[5], [7]])).astype(jnp.float32)
    seconds_emb = jax.random.normal(ks[8], (B, Dca), jnp.float32)        # 2-D path
    seconds_mask = jnp.ones((B,), jnp.float32)
    g1 = jax.random.normal(ks[9], (B, 1, Dg // 2), jnp.float32)          # 3-D -> squeeze(1)
    g2 = jax.random.normal(ks[10], (B, 1, Dg // 2), jnp.float32)
    ic1 = jax.random.normal(ks[11], (B, 1, T), jnp.float32)
    ic2 = jax.random.normal(ks[12], (B, 1, T), jnp.float32)
    pp1 = jax.random.normal(ks[13], (B, P, Dp), jnp.float32)
    pp1_mask = jnp.ones((B, P), jnp.float32)
    cn1 = jax.random.normal(ks[14], (B, Ccn, T), jnp.float32)
    cn2 = jax.random.normal(ks[15], (B, Ccn, T), jnp.float32)

    cond = {
        "prompt": (prompt, prompt_mask),
        "seconds": (seconds_emb, seconds_mask),
        "g_start": (g1, None),
        "g_total": (g2, None),
        "env1": (ic1, None),
        "env2": (ic2, None),
        "pp": (pp1, pp1_mask),
        "cn_a": (cn1, None),
        "cn_b": (cn2, None),
    }

    wrapper = ConditionedControlNetDiffusionModelWrapperPallas(
        params, io_channels=io_channels, sample_rate=44100, min_input_length=32,
        cross_attn_cond_ids=["prompt", "seconds"],
        global_cond_ids=["g_start", "g_total"],
        input_concat_ids=["env1", "env2"],
        prepend_cond_ids=["pp"],
        controlnet_cond_ids=["cn_a", "cn_b"],
    )

    x = jax.random.normal(ks[16], (B, io_channels, T), jnp.float32)
    t = jax.random.uniform(ks[17], (B,), jnp.float32)

    fwd = jax.jit(wrapper.forward)
    out = jax.block_until_ready(fwd(x, t, cond))

    # reference check (same conditioning aggregation semantics, same bf16
    # quantization with f32 accumulation as the kernel)
    ca_ref = jnp.concatenate([prompt, seconds_emb[:, None, :]], axis=1)
    cam_ref = jnp.concatenate([prompt_mask, seconds_mask[:, None]], axis=1)
    g_ref = jnp.squeeze(jnp.concatenate([g1, g2], axis=-1), axis=1)
    ic_ref = jnp.concatenate([ic1, ic2], axis=1)
    cn_ref = cn1 + cn2
    ref = reference_forward(params, jnp.bfloat16, x, t, ic_ref, cn_ref,
                            ca_ref, cam_ref, g_ref, pp1, pp1_mask)

    assert out.shape == (B, io_channels, T)
    assert jnp.allclose(out, ref, atol=1e-3, rtol=1e-3), (
        float(jnp.max(jnp.abs(out - ref))))
    print("KERNEL_OK")
</pallas_src>

<mosaic_0001>
module attributes {stable_mosaic.version = 11 : i64} {
  func.func @_mlp_kernel(%arg0: i32, %arg1: memref<2x4x128xbf16, #tpu.memory_space<vmem>>, %arg2: memref<2x2x128xbf16, #tpu.memory_space<vmem>>, %arg3: memref<2x3x128xbf16, #tpu.memory_space<vmem>>, %arg4: memref<2x32x1xf32, #tpu.memory_space<vmem>>, %arg5: memref<32x4xbf16, #tpu.memory_space<vmem>>, %arg6: memref<32x2xbf16, #tpu.memory_space<vmem>>, %arg7: memref<4x32xbf16, #tpu.memory_space<vmem>>, %arg8: memref<4x3xbf16, #tpu.memory_space<vmem>>, %arg9: memref<2x4x128xf32, #tpu.memory_space<vmem>>) attributes {dimension_semantics = [#tpu.dimension_semantics<parallel>], iteration_bounds = array<i64: 1>, scalar_prefetch = 0 : i64, scratch_operands = 0 : i64, tpu.core_type = #tpu.core_type<tc>, window_params = [{transform_indices = @transform_0, window_bounds = array<i64: 2, 4, 128>}, {transform_indices = @transform_1, window_bounds = array<i64: 2, 2, 128>}, {transform_indices = @transform_2, window_bounds = array<i64: 2, 3, 128>}, {pipeline_mode = #tpu.pipeline_mode<synchronous>, transform_indices = @transform_3, window_bounds = array<i64: 2, 32, 1>}, {pipeline_mode = #tpu.pipeline_mode<synchronous>, transform_indices = @transform_4, window_bounds = array<i64: 32, 4>}, {pipeline_mode = #tpu.pipeline_mode<synchronous>, transform_indices = @transform_5, window_bounds = array<i64: 32, 2>}, {pipeline_mode = #tpu.pipeline_mode<synchronous>, transform_indices = @transform_6, window_bounds = array<i64: 4, 32>}, {pipeline_mode = #tpu.pipeline_mode<synchronous>, transform_indices = @transform_7, window_bounds = array<i64: 4, 3>}, {transform_indices = @transform_8, window_bounds = array<i64: 2, 4, 128>}]} {
    %c0 = arith.constant 0 : index
    %c0_0 = arith.constant 0 : index
    %0 = vector.load %arg5[%c0, %c0_0] : memref<32x4xbf16, #tpu.memory_space<vmem>>, vector<32x4xbf16>
    %c0_1 = arith.constant 0 : index
    %c0_2 = arith.constant 0 : index
    %1 = vector.load %arg6[%c0_1, %c0_2] : memref<32x2xbf16, #tpu.memory_space<vmem>>, vector<32x2xbf16>
    %c0_3 = arith.constant 0 : index
    %c0_4 = arith.constant 0 : index
    %2 = vector.load %arg7[%c0_3, %c0_4] : memref<4x32xbf16, #tpu.memory_space<vmem>>, vector<4x32xbf16>
    %c0_5 = arith.constant 0 : index
    %c0_6 = arith.constant 0 : index
    %3 = vector.load %arg8[%c0_5, %c0_6] : memref<4x3xbf16, #tpu.memory_space<vmem>>, vector<4x3xbf16>
    %c0_7 = arith.constant 0 : index
    %c0_8 = arith.constant 0 : index
    %c0_9 = arith.constant 0 : index
    %4 = vector.load %arg1[%c0_7, %c0_8, %c0_9] : memref<2x4x128xbf16, #tpu.memory_space<vmem>>, vector<1x4x128xbf16>
    %5 = vector.shape_cast %4 : vector<1x4x128xbf16> to vector<4x128xbf16>
    %cst = arith.constant dense<0.000000e+00> : vector<32x128xf32>
    %6 = tpu.matmul %0, %5, %cst {dimension_numbers = #tpu.dot_dimension_numbers<[1], [0], [0], [1], [0, 0, 1, 1], [], []>} : vector<32x4xbf16>, vector<4x128xbf16>, vector<32x128xf32> -> vector<32x128xf32>
    %c0_10 = arith.constant 0 : index
    %c0_11 = arith.constant 0 : index
    %c0_12 = arith.constant 0 : index
    %7 = vector.load %arg2[%c0_10, %c0_11, %c0_12] : memref<2x2x128xbf16, #tpu.memory_space<vmem>>, vector<1x2x128xbf16>
    %8 = vector.shape_cast %7 : vector<1x2x128xbf16> to vector<2x128xbf16>
    %cst_13 = arith.constant dense<0.000000e+00> : vector<32x128xf32>
    %9 = tpu.matmul %1, %8, %cst_13 {dimension_numbers = #tpu.dot_dimension_numbers<[1], [0], [0], [1], [0, 0, 1, 1], [], []>} : vector<32x2xbf16>, vector<2x128xbf16>, vector<32x128xf32> -> vector<32x128xf32>
    %10 = arith.addf %6, %9 : vector<32x128xf32>
    %c0_14 = arith.constant 0 : index
    %c0_15 = arith.constant 0 : index
    %c0_16 = arith.constant 0 : index
    %11 = vector.load %arg4[%c0_14, %c0_15, %c0_16] : memref<2x32x1xf32, #tpu.memory_space<vmem>>, vector<1x32x1xf32>
    %12 = vector.shape_cast %11 : vector<1x32x1xf32> to vector<32x1xf32>
    %13 = vector.broadcast %12 : vector<32x1xf32> to vector<32x128xf32>
    %14 = arith.addf %10, %13 : vector<32x128xf32>
    %cst_17 = arith.constant 0.000000e+00 : f32
    %15 = vector.broadcast %cst_17 : f32 to vector<32x128xf32>
    %16 = arith.maximumf %14, %15 : vector<32x128xf32>
    %17 = arith.truncf %16 : vector<32x128xf32> to vector<32x128xbf16>
    %cst_18 = arith.constant dense<0.000000e+00> : vector<4x128xf32>
    %18 = tpu.matmul %2, %17, %cst_18 {dimension_numbers = #tpu.dot_dimension_numbers<[1], [0], [0], [1], [0, 0, 1, 1], [], []>} : vector<4x32xbf16>, vector<32x128xbf16>, vector<4x128xf32> -> vector<4x128xf32>
    %c0_19 = arith.constant 0 : index
    %c0_20 = arith.constant 0 : index
    %c0_21 = arith.constant 0 : index
    %19 = vector.load %arg3[%c0_19, %c0_20, %c0_21] : memref<2x3x128xbf16, #tpu.memory_space<vmem>>, vector<1x3x128xbf16>
    %20 = vector.shape_cast %19 : vector<1x3x128xbf16> to vector<3x128xbf16>
    %cst_22 = arith.constant dense<0.000000e+00> : vector<4x128xf32>
    %21 = tpu.matmul %3, %20, %cst_22 {dimension_numbers = #tpu.dot_dimension_numbers<[1], [0], [0], [1], [0, 0, 1, 1], [], []>} : vector<4x3xbf16>, vector<3x128xbf16>, vector<4x128xf32> -> vector<4x128xf32>
    %22 = arith.addf %18, %21 : vector<4x128xf32>
    %c0_23 = arith.constant 0 : index
    %c0_24 = arith.constant 0 : index
    %c0_25 = arith.constant 0 : index
    %23 = vector.load %arg9[%c0_23, %c0_24, %c0_25] : memref<2x4x128xf32, #tpu.memory_space<vmem>>, vector<1x4x128xf32>
    %24 = vector.shape_cast %23 : vector<1x4x128xf32> to vector<4x128xf32>
    %25 = vector.shape_cast %22 : vector<4x128xf32> to vector<1x4x128xf32>
    tpu.vector_store %arg9[%c0_23, %c0_24, %c0_25], %25 {strides = array<i32>} : memref<2x4x128xf32, #tpu.memory_space<vmem>>, vector<1x4x128xf32>,
    %c1 = arith.constant 1 : index
    %c0_26 = arith.constant 0 : index
    %c0_27 = arith.constant 0 : index
    %26 = vector.load %arg1[%c1, %c0_26, %c0_27] : memref<2x4x128xbf16, #tpu.memory_space<vmem>>, vector<1x4x128xbf16>
    %27 = vector.shape_cast %26 : vector<1x4x128xbf16> to vector<4x128xbf16>
    %cst_28 = arith.constant dense<0.000000e+00> : vector<32x128xf32>
    %28 = tpu.matmul %0, %27, %cst_28 {dimension_numbers = #tpu.dot_dimension_numbers<[1], [0], [0], [1], [0, 0, 1, 1], [], []>} : vector<32x4xbf16>, vector<4x128xbf16>, vector<32x128xf32> -> vector<32x128xf32>
    %c1_29 = arith.constant 1 : index
    %c0_30 = arith.constant 0 : index
    %c0_31 = arith.constant 0 : index
    %29 = vector.load %arg2[%c1_29, %c0_30, %c0_31] : memref<2x2x128xbf16, #tpu.memory_space<vmem>>, vector<1x2x128xbf16>
    %30 = vector.shape_cast %29 : vector<1x2x128xbf16> to vector<2x128xbf16>
    %cst_32 = arith.constant dense<0.000000e+00> : vector<32x128xf32>
    %31 = tpu.matmul %1, %30, %cst_32 {dimension_numbers = #tpu.dot_dimension_numbers<[1], [0], [0], [1], [0, 0, 1, 1], [], []>} : vector<32x2xbf16>, vector<2x128xbf16>, vector<32x128xf32> -> vector<32x128xf32>
    %32 = arith.addf %28, %31 : vector<32x128xf32>
    %c1_33 = arith.constant 1 : index
    %c0_34 = arith.constant 0 : index
    %c0_35 = arith.constant 0 : index
    %33 = vector.load %arg4[%c1_33, %c0_34, %c0_35] : memref<2x32x1xf32, #tpu.memory_space<vmem>>, vector<1x32x1xf32>
    %34 = vector.shape_cast %33 : vector<1x32x1xf32> to vector<32x1xf32>
    %35 = vector.broadcast %34 : vector<32x1xf32> to vector<32x128xf32>
    %36 = arith.addf %32, %35 : vector<32x128xf32>
    %cst_36 = arith.constant 0.000000e+00 : f32
    %37 = vector.broadcast %cst_36 : f32 to vector<32x128xf32>
    %38 = arith.maximumf %36, %37 : vector<32x128xf32>
    %39 = arith.truncf %38 : vector<32x128xf32> to vector<32x128xbf16>
    %cst_37 = arith.constant dense<0.000000e+00> : vector<4x128xf32>
    %40 = tpu.matmul %2, %39, %cst_37 {dimension_numbers = #tpu.dot_dimension_numbers<[1], [0], [0], [1], [0, 0, 1, 1], [], []>} : vector<4x32xbf16>, vector<32x128xbf16>, vector<4x128xf32> -> vector<4x128xf32>
    %c1_38 = arith.constant 1 : index
    %c0_39 = arith.constant 0 : index
    %c0_40 = arith.constant 0 : index
    %41 = vector.load %arg3[%c1_38, %c0_39, %c0_40] : memref<2x3x128xbf16, #tpu.memory_space<vmem>>, vector<1x3x128xbf16>
    %42 = vector.shape_cast %41 : vector<1x3x128xbf16> to vector<3x128xbf16>
    %cst_41 = arith.constant dense<0.000000e+00> : vector<4x128xf32>
    %43 = tpu.matmul %3, %42, %cst_41 {dimension_numbers = #tpu.dot_dimension_numbers<[1], [0], [0], [1], [0, 0, 1, 1], [], []>} : vector<4x3xbf16>, vector<3x128xbf16>, vector<4x128xf32> -> vector<4x128xf32>
    %44 = arith.addf %40, %43 : vector<4x128xf32>
    %c1_42 = arith.constant 1 : index
    %c0_43 = arith.constant 0 : index
    %c0_44 = arith.constant 0 : index
    %45 = vector.load %arg9[%c1_42, %c0_43, %c0_44] : memref<2x4x128xf32, #tpu.memory_space<vmem>>, vector<1x4x128xf32>
    %46 = vector.shape_cast %45 : vector<1x4x128xf32> to vector<4x128xf32>
    %47 = vector.shape_cast %44 : vector<4x128xf32> to vector<1x4x128xf32>
    tpu.vector_store %arg9[%c1_42, %c0_43, %c0_44], %47 {strides = array<i32>} : memref<2x4x128xf32, #tpu.memory_space<vmem>>, vector<1x4x128xf32>,
    return
  }
  func.func @transform_0(%arg0: i32) -> (i32, i32, i32) {
    %c0_i32 = arith.constant 0 : i32
    %c0_i32_0 = arith.constant 0 : i32
    %c0_i32_1 = arith.constant 0 : i32
    return %c0_i32, %c0_i32_0, %arg0 : i32, i32, i32
  }
  func.func @transform_1(%arg0: i32) -> (i32, i32, i32) {
    %c0_i32 = arith.constant 0 : i32
    %c0_i32_0 = arith.constant 0 : i32
    %c0_i32_1 = arith.constant 0 : i32
    return %c0_i32, %c0_i32_0, %arg0 : i32, i32, i32
  }
  func.func @transform_2(%arg0: i32) -> (i32, i32, i32) {
    %c0_i32 = arith.constant 0 : i32
    %c0_i32_0 = arith.constant 0 : i32
    %c0_i32_1 = arith.constant 0 : i32
    return %c0_i32, %c0_i32_0, %arg0 : i32, i32, i32
  }
  func.func @transform_3(%arg0: i32) -> (i32, i32, i32) {
    %c0_i32 = arith.constant 0 : i32
    %c0_i32_0 = arith.constant 0 : i32
    %c0_i32_1 = arith.constant 0 : i32
    %c0_i32_2 = arith.constant 0 : i32
    return %c0_i32, %c0_i32_0, %c0_i32_1 : i32, i32, i32
  }
  func.func @transform_4(%arg0: i32) -> (i32, i32) {
    %c0_i32 = arith.constant 0 : i32
    %c0_i32_0 = arith.constant 0 : i32
    %c0_i32_1 = arith.constant 0 : i32
    return %c0_i32, %c0_i32_0 : i32, i32
  }
  func.func @transform_5(%arg0: i32) -> (i32, i32) {
    %c0_i32 = arith.constant 0 : i32
    %c0_i32_0 = arith.constant 0 : i32
    %c0_i32_1 = arith.constant 0 : i32
    return %c0_i32, %c0_i32_0 : i32, i32
  }
  func.func @transform_6(%arg0: i32) -> (i32, i32) {
    %c0_i32 = arith.constant 0 : i32
    %c0_i32_0 = arith.constant 0 : i32
    %c0_i32_1 = arith.constant 0 : i32
    return %c0_i32, %c0_i32_0 : i32, i32
  }
  func.func @transform_7(%arg0: i32) -> (i32, i32) {
    %c0_i32 = arith.constant 0 : i32
    %c0_i32_0 = arith.constant 0 : i32
    %c0_i32_1 = arith.constant 0 : i32
    return %c0_i32, %c0_i32_0 : i32, i32
  }
  func.func @transform_8(%arg0: i32) -> (i32, i32, i32) {
    %c0_i32 = arith.constant 0 : i32
    %c0_i32_0 = arith.constant 0 : i32
    %c0_i32_1 = arith.constant 0 : i32
    return %c0_i32, %c0_i32_0, %arg0 : i32, i32, i32
  }
}

</mosaic_0001>

<bundles_post_ra>
// kernel: forward.1
= control target key start
LH: loop header
LB: loop body
LE: loop exit
PB: predicated region body
PF: predicated region fallthrough
CT: control target
= control target key end

     0   :  { %vm60_vm0 = vcmask 1040384   ;;  %vm130_vm1 = vcmask 1041408   ;;  %vm53_vm2 = vcmask 15360   ;;  %vm123_vm3 = vcmask 31744   ;;  %s857_s0 = inlined_call_operand.vmem [shape: bf16[2,4,128], index: 0, kind: input, shape index: {}]   ;;  %s858_s1 = inlined_call_operand.vmem [shape: bf16[2,2,128], index: 1, kind: input, shape index: {}]   ;;  %s859_s2 = inlined_call_operand.vmem [shape: bf16[2,3,128], index: 2, kind: input, shape index: {}]   ;;  %s860_s3 = inlined_call_operand.vmem [shape: f32[2,32,1], index: 3, kind: input, shape index: {}]   ;;  %s861_s4 = inlined_call_operand.vmem [shape: bf16[32,4], index: 4, kind: input, shape index: {}]   ;;  %s862_s5 = inlined_call_operand.vmem [shape: bf16[32,2], index: 5, kind: input, shape index: {}]   ;;  %s863_s6 = inlined_call_operand.vmem [shape: bf16[4,32], index: 6, kind: input, shape index: {}]   ;;  %s864_s7 = inlined_call_operand.vmem [shape: bf16[4,3], index: 7, kind: input, shape index: {}]   ;;  %s865_s8 = inlined_call_operand.hbm [shape: f32[2,4,128], index: 8, kind: output, shape index: {}]  }
   0x1   :  { %v42_v0 = vld [vmem:[%s858_s1] sm:$0x1]  ;;  %v670_v6 = vld [vmem:[%s862_s5 + $0x8] sm:$0xff]   ;;  %v694_v8 = vmov 0   ;;  %v185_v9 = vld [vmem:[%s860_s3 + $0x10] sm:$0xff] }
   0x2   :  { %v41_v1 = vld [vmem:[%s857_s0] sm:$0x3]  ;;  %655 = vmatprep.subr.msk.bf16.mxu0 %vm60_vm0, %v42_v0  ;;  %v62_v2 = vsel %vm60_vm0, %v42_v0, 0  ;;  %v773_v7 = vld [vmem:[%s861_s4 + $0x8] sm:$0xff]   ;;  %666 = vset.pattern.permute.xlu0 %v694_v8  ;;  %v186_v11 = vld [vmem:[%s860_s3 + $0x18] sm:$0xff] }
   0x3   :  { %656 = vmatprep.subr.msk.bf16.mxu1 %vm130_vm1, %v41_v1  ;;  %v132_v3 = vsel %vm130_vm1, %v41_v1, 0  ;;  %604 = vmatpush3.bf16.msra.mxu0 %v62_v2  ;;  %v668_v4 = vld [vmem:[%s862_s5] sm:$0xff]  }
   0x4   :  { %610 = vmatpush3.bf16.msra.mxu1 %v132_v3  ;;  %v762_v5 = vld [vmem:[%s861_s4] sm:$0xff]   ;;  %605 = vmatprep.mubr.msk.bf16.mxu0 %vm53_vm2, %v668_v4 }
   0x5   :  { %611 = vmatprep.mubr.msk.bf16.mxu1 %vm123_vm3, %v762_v5  ;;  %199 = vperm.xlu0 %666, %v185_v9   ;;  %v183_v10 = vld [vmem:[%s860_s3] sm:$0xff] }
   0x6   :  { %606 = vmatmul.mubr.msk.bf16.vlgmr.msra.gmra.mxu0 %vm53_vm2, %v670_v6  ;;  %667 = vset.pattern.permute.xlu1 %v694_v8 }
   0x7   :  { %612 = vmatmul.mubr.msk.bf16.vlgmr.msra.gmra.mxu1 %vm123_vm3, %v773_v7  ;;  %189 = vperm.xlu1 %667, %v183_v10  }
   0x8   :  { %13 = vsyncpa [#allocation3], 0  ;;  %v184_v12 = vld [vmem:[%s860_s3 + $0x8] sm:$0xff]  ;;  %v576_v13 = vld [vmem:[%s860_s3 + $0x30] sm:$0xff]  ;;  %v695_v17 = vmov 65535   ;;  %v696_v22 = vmov 0.0  }
   0x9   :  { %204 = vperm.xlu0 %666, %v186_v11   ;;  %v577_v14 = vld [vmem:[%s860_s3 + $0x38] sm:$0xff]  ;;  %v574_v15 = vld [vmem:[%s860_s3 + $0x20] sm:$0xff]  ;;  %v575_v16 = vld [vmem:[%s860_s3 + $0x28] sm:$0xff]  ;;  %v222_v18 = vsel %vm60_vm0, 4294967295, %v695_v17  ;;  %615 = vmatprep.subr.bf16.mxu0 %v696_v22  ;;  %vm697_vm4 = vmmov 0   ;;  %vm218_vm5 = vcmask 23552  }
   0xa   :  { %v217_v19 = vld [vmem:[%s859_s2] sm:$0x3]  ;;  %v807_v20 = vsel %vm130_vm1, %v222_v18, 0  ;;  %621 = vmatprep.subr.bf16.mxu1 %v696_v22  ;;  %617 = vmatprep.mubr.msk.bf16.mxu0 %vm697_vm4, %v696_v22  ;;  %v568_v52 = vld [vmem:[%s857_s0 + $0x2] sm:$0x3]  ;;  %vm267_vm6 = vcmask 261120  }
   0xb   :  { %194 = vperm.xlu1 %667, %v184_v12   ;;  %v225_v21 = vand.u32 %v807_v20, %v217_v19  ;;  %v40_v23 = vld [vmem:[%s864_s7] sm:$0x3]  ;;  %625 = vmatprep.mubr.msk.bf16.mxu1 %vm697_vm4, %v696_v22  ;;  %v369_v54 = vsel %vm130_vm1, %v568_v52, 0  ;;  %v578_v59 = vld [vmem:[%s859_s2 + $0x2] sm:$0x3]  ;;  %s698_s2 = smov [#allocation2]  }
   0xc   :  { %v569_v24 = vld [vmem:[%s858_s1 + $0x1] sm:$0x1]  ;;  %v458_v60 = vand.u32 %v578_v59, %v807_v20  ;;  %s547_s16 = sshll.u32 %s698_s2, 4  ;;  %s548_s16 = int_to_ptr.vmem [resolvable:$true] %s547_s16 }
   0xd   :  { %437 = vperm.xlu0 %666, %v576_v13   ;;  %616 = vmatpush3.bf16.msra.mxu0 %v225_v21  ;;  %v317_v25 = vsel %vm60_vm0, %v569_v24, 0  ;;  %v39_v53 = vld [vmem:[%s863_s6] sm:$0x3]  ;;  %s672_s17 = scalar_lea.vmem %s548_s16, 128  ;;  %p677_p1 = scmp.lt.s32.totalorder %s548_s16, %s548_s16 }
   0xe   :  { %657 = vmatprep.subr.msk.bf16.mxu0 %vm60_vm0, %v569_v24  ;;  %p673_p0 = scmp.ne.s32.totalorder %s548_s16, %s672_s17  ;;  %p678_p2 = scmp.lt.s32.totalorder %s672_s17, %s672_s17 }
   0xf   :  { %442 = vperm.xlu1 %667, %v577_v14  }
  0x10   :  { %618 = vmatmul.mubr.msk.bf16.vlgmr.msra.gmra.mxu0 %vm218_vm5, %v40_v23  ;;  %p679_p3 = por %p678_p2, %p677_p1 }
  0x11   :  { %427 = vperm.xlu0 %666, %v574_v15   ;;  %631 = vmatprep.mubr.msk.bf16.mxu0 %vm53_vm2, %v668_v4 }
  0x12   :  { %630 = vmatpush3.bf16.msra.mxu0 %v317_v25  ;;  %p680_p4 = pnand %p679_p3, %p673_p0 }
  0x13   :  { %432 = vperm.xlu1 %667, %v575_v16   ;;  %641 = vmatprep.subr.bf16.mxu0 %v696_v22 }
  0x18   :  { %632 = vmatmul.mubr.msk.bf16.vlgmr.msra.gmra.mxu0 %vm53_vm2, %v670_v6 }
  0x19   :  { %643 = vmatprep.mubr.msk.bf16.mxu0 %vm697_vm4, %v696_v22  ;;  %642 = vmatpush3.bf16.msra.mxu0 %v458_v60 }
  0x20   :  { %644 = vmatmul.mubr.msk.bf16.vlgmr.msra.gmra.mxu0 %vm218_vm5, %v40_v23 }
  0x80   :  { %v200_v27 = vpop.permute.xlu0 %199 }
  0x82   :  { %v190_v31 = vpop.permute.xlu1 %189 }
  0x84   :  { %v205_v39 = vpop.permute.xlu0 %204 }
  0x86   :  { %v195_v43 = vpop.permute.xlu1 %194 }
  0x8a   :  { %v443_v6 = vpop.permute.xlu1 %442 }
  0x8e   :  { %v433_v19 = vpop.permute.xlu1 %432 }
  0xc6   :  { %v607_v26 = vpop.f32.mrf.mxu0 }
  0xc7   :  { %v613_v28 = vpop.f32.mrf.mxu1 }
  0xc8   :  { %v177_v29 = vadd.f32 %v613_v28, %v607_v26  ;;  %v98_v30 = vpop.f32.mrf.mxu0 }
  0xc9   :  { %v168_v32 = vpop.f32.mrf.mxu1 }
  0xca   :  { %v608_v33 = vpop.f32.mrf.mxu0  ;;  %v209_v35 = vadd.f32 %v200_v27, %v177_v29  ;;  %v169_v36 = vadd.f32 %v168_v32, %v98_v30 }
  0xcb   :  { %v614_v34 = vpop.f32.mrf.mxu1 }
  0xcc   :  { %v180_v37 = vadd.f32 %v614_v34, %v608_v33  ;;  %v101_v38 = vpop.f32.mrf.mxu0  ;;  %v213_v44 = vmax.f32 %v209_v35, 0.0  ;;  %v207_v45 = vadd.f32 %v190_v31, %v169_v36 }
  0xcd   :  { %v171_v40 = vpop.f32.mrf.mxu1 }
  0xce   :  { %v210_v41 = vadd.f32 %v205_v39, %v180_v37  ;;  %v172_v42 = vadd.f32 %v171_v40, %v101_v38  ;;  %v211_v50 = vmax.f32 %v207_v45, 0.0 }
  0xd0   :  { %v214_v46 = vmax.f32 %v210_v41, 0.0  ;;  %v208_v47 = vadd.f32 %v195_v43, %v172_v42  ;;  %v261_v55 = vpop.f32.mrf.mxu0 }
  0xd2   :  { %v216_v48 = vpack.c.bf16 %v214_v46, %v213_v44  ;;  %v212_v49 = vmax.f32 %v208_v47, 0.0  ;;  %v619_v56 = vpop.f32.mrf.mxu0 }
  0xd4   :  { %622 = vmatpush3.bf16.msra.mxu1 %v216_v48  ;;  %v215_v51 = vpack.c.bf16 %v212_v49, %v211_v50  ;;  %v264_v57 = vpop.f32.mrf.mxu0 }
  0xd5   :  { %623 = vmatprep.subr.bf16.mxu1 %v696_v22 }
  0xd6   :  { %v620_v58 = vpop.f32.mrf.mxu0 }
  0xd8   :  { %624 = vmatpush3.bf16.msra.mxu1 %v215_v51  ;;  %v633_v0 = vpop.f32.mrf.mxu0 }
  0xd9   :  { %658 = vmatprep.subr.msk.bf16.mxu1 %vm130_vm1, %v568_v52 }
  0xda   :  { %v353_v2 = vpop.f32.mrf.mxu0 }
  0xdb   :  { %626 = vmatmul.mubr.msk.bf16.vlgmr.msra.gmra.mxu1 %vm267_vm6, %v39_v53 }
  0xdc   :  { %636 = vmatpush3.bf16.msra.mxu1 %v369_v54  ;;  %637 = vmatprep.mubr.msk.bf16.mxu1 %vm123_vm3, %v762_v5  ;;  %v438_v5 = vpop.permute.xlu0 %437  ;;  %v634_v8 = vpop.f32.mrf.mxu0 }
  0xdd   :  { %647 = vmatprep.subr.bf16.mxu1 %v696_v22 }
  0xde   :  { %v356_v14 = vpop.f32.mrf.mxu0 }
  0xe0   :  { %v428_v18 = vpop.permute.xlu0 %427  ;;  %v494_v29 = vpop.f32.mrf.mxu0 }
  0xe2   :  { %v645_v30 = vpop.f32.mrf.mxu0 }
  0xe3   :  { %638 = vmatmul.mubr.msk.bf16.vlgmr.msra.gmra.mxu1 %vm123_vm3, %v773_v7 }
  0xe4   :  { %651 = vmatprep.mubr.msk.bf16.mxu1 %vm697_vm4, %v696_v22  ;;  %v497_v31 = vpop.f32.mrf.mxu0 }
  0xe6   :  { %v646_v32 = vpop.f32.mrf.mxu0 }
 0x19b   :  { %v305_v61 = vpop.f32.mrf.mxu1 }
 0x19c   :  { %v306_v62 = vadd.f32 %v305_v61, %v261_v55 }
 0x19d   :  { %v627_v63 = vpop.f32.mrf.mxu1 }
 0x19e   :  { %311 = vst [vmem:[#allocation2] sm:$0xf] %v306_v62 }
 0x19f   :  { %v308_v1 = vpop.f32.mrf.mxu1 }
 0x1a1   :  { %v628_v3 = vpop.f32.mrf.mxu1 }
 0x1a3   :  { %v639_v4 = vpop.f32.mrf.mxu1 }
 0x1a4   :  { %v414_v7 = vadd.f32 %v639_v4, %v633_v0 }
 0x1a5   :  { %v405_v9 = vpop.f32.mrf.mxu1 }
 0x1a6   :  { %v447_v11 = vadd.f32 %v438_v5, %v414_v7  ;;  %v406_v12 = vadd.f32 %v405_v9, %v353_v2 }
 0x1a7   :  { %v640_v10 = vpop.f32.mrf.mxu1 }
 0x1a8   :  { %v417_v13 = vadd.f32 %v640_v10, %v634_v8  ;;  %v451_v20 = vmax.f32 %v447_v11, 0.0  ;;  %v445_v21 = vadd.f32 %v428_v18, %v406_v12 }
 0x1a9   :  { %v408_v15 = vpop.f32.mrf.mxu1 }
 0x1aa   :  { %v448_v16 = vadd.f32 %v443_v6, %v417_v13  ;;  %v409_v17 = vadd.f32 %v408_v15, %v356_v14  ;;  %v449_v27 = vmax.f32 %v445_v21, 0.0 }
 0x1ac   :  { %v452_v23 = vmax.f32 %v448_v16, 0.0  ;;  %v446_v24 = vadd.f32 %v433_v19, %v409_v17 }
 0x1ae   :  { %v454_v25 = vpack.c.bf16 %v452_v23, %v451_v20  ;;  %v450_v26 = vmax.f32 %v446_v24, 0.0 }
 0x1b0   :  { %648 = vmatpush3.bf16.msra.mxu1 %v454_v25  ;;  %v453_v28 = vpack.c.bf16 %v450_v26, %v449_v27 }
 0x1b1   :  { %649 = vmatprep.subr.bf16.mxu1 %v696_v22 }
 0x1b4   :  { %650 = vmatpush3.bf16.msra.mxu1 %v453_v28 }
 0x1b7   :  { %652 = vmatmul.mubr.msk.bf16.vlgmr.msra.gmra.mxu1 %vm267_vm6, %v39_v53 }
 0x277   :  { %v534_v33 = vpop.f32.mrf.mxu1 }
 0x278   :  { %v535_v34 = vadd.f32 %v534_v33, %v494_v29 }
 0x279   :  { %v653_v35 = vpop.f32.mrf.mxu1 }
 0x27a   :  { %541 = vst [vmem:[#allocation2 + $0x4] sm:$0xf] %v535_v34 }
 0x27b   :  { %v537_v36 = vpop.f32.mrf.mxu1 }
 0x27c   :  { %683 = shalt.err (!%p680_p4)
}
 0x27d   :  { %s699_s18 = smov 64   ;;  %s700_s19 = smov 4   ;;  %v654_v22 = vpop.f32.mrf.mxu1 }
 0x27e   :  { %553 = dma.vmem_to_hbm [thread:$0]  %s548_s16, 128, %s865_s8, [#allocation3], %s699_s18, %s699_s18, %s700_s19  }
 0x27f   :  { %692 = dma.done.wait [#allocation3], 128  }
 0x280   :  { %693 = vsyncadd [#allocation3], 4294967168 }
 0x281   :  { %557 = vsyncpa [#allocation3], 1 }

</bundles_post_ra>
